<compile_context>
chip_gen: v7x
topology: tpu7x:2x2x1
jax: 0.10.0
libtpu: 0.0.40
codegen_flags: <defaults>
</compile_context>

<pallas_src>
import jax
import jax.numpy as jnp
from jax.experimental import pallas as pl
from jax.experimental.pallas import tpu as pltpu


# ---------------------------------------------------------------------------
# Primary (production) path: metadata-only reshape, no kernel, no DMA.
# ---------------------------------------------------------------------------
def flatten_from_dim1(x):
    """Equivalent of torch.flatten(x, 1): collapse all dims after dim 0."""
    n = x.shape[0]
    flat = 1
    for d in x.shape[1:]:
        flat *= d
    return x.reshape(n, flat)


# ---------------------------------------------------------------------------
# Fusion-template path: tiled, lane-dense Pallas kernel.
# On its own this is strictly slower than the reshape above; it exists so
# that a real producer/consumer kernel can adopt the (N, C*H*W) block layout
# directly as its out_spec / in_spec instead of materializing the flatten.
# ---------------------------------------------------------------------------
def _identity_copy_kernel(x_ref, o_ref):
    # In a fused kernel, the producer's compute would write directly into
    # this flattened, lane-dense block layout.
    o_ref[...] = x_ref[...]


def _sublane_align(dtype):
    # f32 -> 8, bf16 -> 16, int8/fp8 -> 32 sublanes per unpadded tile.
    itemsize = jnp.dtype(dtype).itemsize
    return max(8, 8 * (4 // max(1, itemsize)))


def _pick_tile(dim, align, max_tile):
    """Largest tile <= max_tile that is a multiple of `align` and divides
    `dim`. Falls back to the full dim (always legal for a BlockSpec)."""
    if dim % align != 0:
        return dim
    t = min(dim, max_tile)
    t = (t // align) * align
    while t > 0 and dim % t != 0:
        t -= align
    return t if t > 0 else dim


def flatten_from_dim1_pallas(x, *, max_rows=256, max_cols=2048):
    """Flatten-from-dim-1 expressed as a tiled Pallas identity kernel.

    max_rows/max_cols cap the per-block VMEM footprint: with double-buffered
    input + output (~4x tile resident), the default 256x2048 f32 tile keeps
    the kernel at ~8 MiB of VMEM — safe under v5e's 16 MiB and v7x's 32 MiB
    scoped defaults without raising vmem_limit_bytes.
    """
    n = x.shape[0]
    flat = 1
    for d in x.shape[1:]:
        flat *= d
    x2d = x.reshape(n, flat)  # metadata-only glue

    row_align = _sublane_align(x.dtype)
    tr = _pick_tile(n, row_align, max_rows)
    tc = _pick_tile(flat, 128, max_cols)
    grid = (n // tr, flat // tc)

    return pl.pallas_call(
        _identity_copy_kernel,
        out_shape=jax.ShapeDtypeStruct((n, flat), x.dtype),
        grid_spec=pltpu.PrefetchScalarGridSpec(
            num_scalar_prefetch=0,
            grid=grid,
            in_specs=[pl.BlockSpec((tr, tc), lambda i, j: (i, j))],
            out_specs=pl.BlockSpec((tr, tc), lambda i, j: (i, j)),
        ),
        # Pure elementwise copy: every block is independent, so both axes are
        # parallel. On v7x this shards the grid across the 2 TensorCores.
        compiler_params=pltpu.CompilerParams(
            dimension_semantics=("parallel", "parallel"),
        ),
        # NOTE: aliasing only avoids allocating a second HBM buffer; the
        # HBM->VMEM load and VMEM->HBM store still happen.
        input_output_aliases={0: 0},
    )(x2d)


if __name__ == "__main__":
    key = jax.random.PRNGKey(0)

    # --- Exact shape from the PyTorch module: (1, 1920, 1, 1) ---------------
    x709 = jax.random.normal(key, (1, 1920, 1, 1), dtype=jnp.float32)
    ref = x709.reshape(1, 1920)

    # Production path: metadata-only reshape (zero data movement).
    x710 = flatten_from_dim1(x709)
    jax.block_until_ready(x710)
    assert x710.shape == (1, 1920), x710.shape
    assert x710.dtype == x709.dtype
    assert bool(jnp.array_equal(x710, ref))

    # Fusion-template Pallas path at the module's shape (falls back to a
    # single (1, 1920) block since N=1 is not sublane-tileable).
    x710_k = flatten_from_dim1_pallas(x709)
    jax.block_until_ready(x710_k)
    assert x710_k.shape == (1, 1920), x710_k.shape
    assert x710_k.dtype == x709.dtype
    assert bool(jnp.array_equal(x710_k, ref))

    # --- Small aligned batch to exercise the tiled / gridded template -------
    key2 = jax.random.PRNGKey(1)
    xb = jax.random.normal(key2, (16, 3, 8, 16), dtype=jnp.float32)  # flat = 384
    refb = xb.reshape(16, 384)
    outb = flatten_from_dim1_pallas(xb, max_rows=8, max_cols=128)  # grid (2, 3)
    jax.block_until_ready(outb)
    assert outb.shape == (16, 384), outb.shape
    assert bool(jnp.array_equal(outb, refb))

    print("KERNEL_OK")
</pallas_src>

<mosaic_0001>
module attributes {stable_mosaic.version = 11 : i64} {
  func.func @_identity_copy_kernel(%arg0: i32, %arg1: i32, %arg2: memref<1x1920xf32, #tpu.memory_space<vmem>>, %arg3: memref<1x1920xf32, #tpu.memory_space<vmem>>) attributes {dimension_semantics = [#tpu.dimension_semantics<parallel>, #tpu.dimension_semantics<parallel>], iteration_bounds = array<i64: 1, 1>, scalar_prefetch = 0 : i64, scratch_operands = 0 : i64, tpu.core_type = #tpu.core_type<tc>, window_params = [{transform_indices = @transform_0, window_bounds = array<i64: 1, 1920>}, {transform_indices = @transform_1, window_bounds = array<i64: 1, 1920>}]} {
    %c0 = arith.constant 0 : index
    %c0_0 = arith.constant 0 : index
    %0 = vector.load %arg2[%c0, %c0_0] : memref<1x1920xf32, #tpu.memory_space<vmem>>, vector<1x1920xf32>
    %c0_1 = arith.constant 0 : index
    %c0_2 = arith.constant 0 : index
    %1 = vector.load %arg3[%c0_1, %c0_2] : memref<1x1920xf32, #tpu.memory_space<vmem>>, vector<1x1920xf32>
    tpu.vector_store %arg3[%c0_1, %c0_2], %0 {strides = array<i32>} : memref<1x1920xf32, #tpu.memory_space<vmem>>, vector<1x1920xf32>,
    return
  }
  func.func @transform_0(%arg0: i32, %arg1: i32) -> (i32, i32) {
    %c0_i32 = arith.constant 0 : i32
    return %arg0, %arg1 : i32, i32
  }
  func.func @transform_1(%arg0: i32, %arg1: i32) -> (i32, i32) {
    %c0_i32 = arith.constant 0 : i32
    return %arg0, %arg1 : i32, i32
  }
}

</mosaic_0001>

<bundles_post_ra>
// kernel: tpu_custom_call.1
= control target key start
LH: loop header
LB: loop body
LE: loop exit
PB: predicated region body
PF: predicated region fallthrough
CT: control target
= control target key end

     0   :  { %6 = vsyncpa [#allocation3], 0  ;;  %s130_s0 = inlined_call_operand.hbm [shape: f32[1,1920], index: 0, kind: input, shape index: {}, may-alias: {0,1}]   ;;  %s131_s1 = inlined_call_operand.hbm [shape: f32[1,1920], index: 1, kind: output, shape index: {}, may-alias: {0,1}]  }
   0x1   :  { %7 = vsyncpa [#allocation4], 0  ;;  %s94_s6 = smov [#allocation2]   ;;  %s46_s10 = scalar_lea.hbm %s130_s0, 240 }
   0x2   :  { %s14_s7 = sshll.u32 %s94_s6, 4  ;;  %p47_p0 = scmp.ne.s32.totalorder %s130_s0, %s46_s10  ;;  %s15_s7 = int_to_ptr.vmem [resolvable:$true] %s14_s7 }
   0x3   :  { %p50_p1 = scmp.lt.u32.totalorder %s46_s10, %s130_s0 }
   0x5   :  { %p52_p2 = pnand %p50_p1, %p47_p0 }
   0x7   :  { %55 = shalt.err (!%p52_p2)
}
   0x8   :  { %s56_s15 = scalar_lea.vmem %s15_s7, 240  ;;  %s60_s16 = scalar_lea.vmem %s15_s7, 256 }
   0x9   :  { %p57_p3 = scmp.ne.s32.totalorder %s15_s7, %s56_s15  ;;  %p61_p4 = scmp.lt.s32.totalorder %s15_s7, %s15_s7 }
   0xa   :  { %p62_p5 = scmp.lt.s32.totalorder %s60_s16, %s56_s15 }
   0xc   :  { %p63_p6 = por %p62_p5, %p61_p4 }
   0xe   :  { %p64_p7 = pnand %p63_p6, %p57_p3 }
  0x10   :  { %67 = shalt.err (!%p64_p7)
}
  0x11   :  { %17 = dma.hbm_to_vmem [thread:$0]  %s130_s0, 240, %s15_s7, [#allocation3]  }
  0x12   :  { %90 = dma.done.wait [#allocation3], 240  }
  0x13   :  { %91 = vsyncadd [#allocation3], 4294967056  ;;  %v24_v0 = vlaneseq  ;;  %s95_s19 = smov [#allocation5]   ;;  %v21_v1 = vld [vmem:[#allocation2] sm:$0xff]  ;;  %v22_v2 = vld [vmem:[#allocation2 + $0x8] sm:$0xff] }
  0x14   :  { %s35_s20 = sshll.u32 %s95_s19, 4  ;;  %23 = vst [vmem:[#allocation5] sm:$0xff] %v21_v1  ;;  %s36_s20 = int_to_ptr.vmem [resolvable:$true] %s35_s20 }
  0x15   :  { %vm26_vm0 = vcmp.lt.s32.totalorder %v24_v0, 896  ;;  %s68_s21 = scalar_lea.vmem %s36_s20, 240  ;;  %s72_s22 = scalar_lea.vmem %s36_s20, 256 }
  0x16   :  { %28 = vst.msk [vmem:[#allocation5 + $0x8] sm:$0x7f] %vm26_vm0, %v22_v2  ;;  %p69_p8 = scmp.ne.s32.totalorder %s36_s20, %s68_s21  ;;  %p73_p9 = scmp.lt.s32.totalorder %s36_s20, %s36_s20 }
  0x17   :  { %p74_p10 = scmp.lt.s32.totalorder %s72_s22, %s68_s21 }
  0x19   :  { %p75_p11 = por %p74_p10, %p73_p9 }
  0x1b   :  { %p76_p12 = pnand %p75_p11, %p69_p8 }
  0x1d   :  { %79 = shalt.err (!%p76_p12)
}
  0x1e   :  { %s80_s24 = scalar_lea.hbm %s131_s1, 240 }
  0x1f   :  { %p81_p13 = scmp.ne.s32.totalorder %s131_s1, %s80_s24  ;;  %p84_p0 = scmp.lt.u32.totalorder %s80_s24, %s131_s1 }
  0x21   :  { %p86_p1 = pnand %p84_p0, %p81_p13 }
  0x23   :  { %89 = shalt.err (!%p86_p1)
}
  0x24   :  { %38 = dma.vmem_to_hbm [thread:$0]  %s36_s20, 240, %s131_s1, [#allocation4]  }
  0x25   :  { %92 = dma.done.wait [#allocation4], 240  }
  0x26   :  { %93 = vsyncadd [#allocation4], 4294967056 }
  0x27   :  { %42 = vsyncpa [#allocation3], 1 }
  0x28   :  { %43 = vsyncpa [#allocation4], 1 }

</bundles_post_ra>
